<compile_context>
chip_gen: v6e
topology: v6e:2x2x1
jax: 0.10.0
libtpu: 0.0.40
codegen_flags: <defaults>
</compile_context>

<pallas_src>
import numpy as np
import jax
import jax.numpy as jnp
from jax.experimental import pallas as pl
from jax.experimental.pallas import tpu as pltpu


def _round_up(v, m):
    return ((v + m - 1) // m) * m


def _conv_out_size(size, k, stride, pad):
    return (size + 2 * pad - k) // stride + 1


def _conv_as_matrix(w_scaled, ih, iw, oh, ow, stride, pad):
    """Dense operator K with rows indexed by flat-NCHW input (ci, r, c) and
    columns by flat-NCHW output (co, orow, ocol), so that
        flat_out = flat_in @ K
    reproduces the bias-free conv.  The 0/1 gather structure is a trace-time
    numpy constant; only a tiny einsum against the (runtime) weights is an
    XLA op."""
    cout, cin, kh, kw = w_scaled.shape
    t = np.zeros((kh * kw, ih * iw, oh * ow), np.float32)
    for ki in range(kh):
        for kj in range(kw):
            p = ki * kw + kj
            for orow in range(oh):
                r = orow * stride - pad + ki
                if not 0 <= r < ih:
                    continue
                for ocol in range(ow):
                    c = ocol * stride - pad + kj
                    if 0 <= c < iw:
                        t[p, r * iw + c, orow * ow + ocol] = 1.0
    t = jnp.asarray(t)
    wp = jnp.transpose(w_scaled, (2, 3, 1, 0)).reshape(kh * kw, cin, cout)
    k = jnp.einsum("pic,pro->irco", wp, t,
                   precision=jax.lax.Precision.HIGHEST)
    return k.reshape(cin * ih * iw, cout * oh * ow)


def _make_kernel(kin):
    def kernel(x_ref, k_ref, sh_ref, o_ref):
        # x_ref : (N, KIN)      flat NCHW inputs, one row per batch element
        # k_ref : (2, KP, CP)   k_ref[0,:KIN,:] = K1, k_ref[1] = K2 (BN scale folded)
        # sh_ref: (2, CP)       per-stage BN shift (broadcast over spatial),
        #                       zero beyond the valid columns
        # o_ref : (N, CP)       flat NCHW outputs (cols >= M2 are exactly 0)
        x = x_ref[...]
        # conv1 + bn + hardtanh  (one MXU push, f32 accumulation)
        y1 = jnp.dot(x, k_ref[0, :kin, :], preferred_element_type=jnp.float32)
        y1 = jnp.clip(y1 + sh_ref[0:1, :], -1.0, 1.0)
        # conv2 + bn + hardtanh  (one MXU push)
        y2 = jnp.dot(y1, k_ref[1, :y1.shape[1], :],
                     preferred_element_type=jnp.float32)
        o_ref[...] = jnp.clip(y2 + sh_ref[1:2, :], -1.0, 1.0).astype(o_ref.dtype)
    return kernel


def conv2d_batchnorm_forward(x, params, *, stride=4, padding=1):
    """Conv2dBatchNorm.forward (transpose=False).  NCHW in, NCHW out.

    BatchNorm runs in inference mode from running stats (matching .eval() in
    the export tests); the single BN instance is shared by both conv stages,
    exactly as in the PyTorch module.
    """
    eps = 1e-5
    scale = params["bn_weight"] * jax.lax.rsqrt(params["bn_running_var"] + eps)
    shift = params["bn_bias"] - params["bn_running_mean"] * scale

    w1, w2 = params["conv1_w"], params["conv2_w"]
    n, cin, ih, iw = x.shape
    c1, cin1, kh1, kw1 = w1.shape
    c2, cin2, kh2, kw2 = w2.shape
    nbn = shift.shape[0]
    assert cin1 == cin and cin2 == c1, "conv channel chain mismatch"
    assert c1 == nbn and c2 == nbn, (
        "shared BatchNorm requires both convs' out-channels == BN channels")

    oh1 = _conv_out_size(ih, kh1, stride, padding)
    ow1 = _conv_out_size(iw, kw1, stride, padding)
    oh2 = _conv_out_size(oh1, kh2, stride, padding)
    ow2 = _conv_out_size(ow1, kw2, stride, padding)

    kin = cin * ih * iw                    # stage-1 contraction length
    m1 = c1 * oh1 * ow1                    # stage-1 output / stage-2 contraction
    m2 = c2 * oh2 * ow2                    # stage-2 output width (valid cols)
    kin_p = _round_up(kin, 8)
    cp = _round_up(max(m1, m2), 128)       # lane dim: 128 -> lane-dense stores
    kp = _round_up(max(kin_p, cp), 8)      # shared row dim of the packed K array

    # Dense conv-as-matmul operators with the BN scale folded into the weights
    # (exact: the convs have no bias, so conv(x, w) * s == conv(x, w * s)).
    k1 = _conv_as_matrix(w1.astype(jnp.float32) * scale[:, None, None, None],
                         ih, iw, oh1, ow1, stride, padding)
    k2 = _conv_as_matrix(w2.astype(jnp.float32) * scale[:, None, None, None],
                         oh1, ow1, oh2, ow2, stride, padding)
    kmat = (jnp.zeros((2, kp, cp), jnp.float32)
            .at[0, :kin, :m1].set(k1)
            .at[1, :m1, :m2].set(k2))
    shifts = (jnp.zeros((2, cp), jnp.float32)
              .at[0, :m1].set(jnp.repeat(shift, oh1 * ow1))
              .at[1, :m2].set(jnp.repeat(shift, oh2 * ow2)))

    # Free view: NCHW flat ordering is folded into K1's row ordering.
    x_flat = x.reshape(n, kin).astype(jnp.float32)
    if kin_p != kin:                       # not taken for this module's shapes
        x_flat = jnp.pad(x_flat, ((0, 0), (0, kin_p - kin)))

    out = pl.pallas_call(
        _make_kernel(kin_p),
        out_shape=jax.ShapeDtypeStruct((n, cp), jnp.float32),
        grid=(1,),
        in_specs=[
            pl.BlockSpec((n, kin_p), lambda i: (0, 0)),       # x (all batches at once)
            pl.BlockSpec((2, kp, cp), lambda i: (0, 0, 0)),   # packed K1 | K2
            pl.BlockSpec((2, cp), lambda i: (0, 0)),          # packed BN shifts
        ],
        out_specs=pl.BlockSpec((n, cp), lambda i: (0, 0)),
        compiler_params=pltpu.CompilerParams(
            dimension_semantics=("arbitrary",),
        ),
    )(x_flat, kmat, shifts)

    # Output columns are already in flat NCHW order -> cheap slice + reshape.
    return out[:, :m2].reshape(n, c2, oh2, ow2)


def _ref_forward(x, params, *, stride=4, padding=1):
    """Pure-JAX reference (lax.conv), BN in inference mode, hardtanh clamp."""
    eps = 1e-5
    scale = params["bn_weight"] * jax.lax.rsqrt(params["bn_running_var"] + eps)
    shift = params["bn_bias"] - params["bn_running_mean"] * scale

    def conv(v, w):
        return jax.lax.conv_general_dilated(
            v, w, window_strides=(stride, stride),
            padding=((padding, padding), (padding, padding)),
            dimension_numbers=("NCHW", "OIHW", "NCHW"),
            precision=jax.lax.Precision.HIGHEST)

    def bn_ht(y):
        return jnp.clip(y * scale[None, :, None, None]
                        + shift[None, :, None, None], -1.0, 1.0)

    y = bn_ht(conv(x, params["conv1_w"]))
    y = bn_ht(conv(y, params["conv2_w"]))
    return y


if __name__ == "__main__":
    key = jax.random.PRNGKey(0)
    k_x, k1, k2, k3, k4, k5, k6 = jax.random.split(key, 7)

    # Conv2d(2, 2, (2, 2), bias=False, padding=[1, 1], stride=[4, 4]) x 2,
    # sharing one (randomized) BatchNorm2d(2).
    params = {
        "conv1_w": jax.random.normal(k1, (2, 2, 2, 2), jnp.float32) * 0.5,
        "conv2_w": jax.random.normal(k2, (2, 2, 2, 2), jnp.float32) * 0.5,
        "bn_weight": jax.random.uniform(k3, (2,), jnp.float32, minval=0.5, maxval=1.5),
        "bn_bias": jax.random.normal(k4, (2,), jnp.float32) * 0.1,
        "bn_running_mean": jax.random.normal(k5, (2,), jnp.float32) * 0.1,
        "bn_running_var": jax.random.uniform(k6, (2,), jnp.float32, minval=0.5, maxval=1.5),
    }

    # get_inputs(): torch.randn(2, 2, 4, 4)   (NCHW)
    x = jax.random.normal(k_x, (2, 2, 4, 4), jnp.float32)

    fwd = jax.jit(conv2d_batchnorm_forward, static_argnames=("stride", "padding"))
    out = jax.block_until_ready(fwd(x, params))
    assert out.shape == (2, 2, 1, 1), out.shape

    ref = jax.block_until_ready(_ref_forward(x, params))
    assert out.shape == ref.shape, (out.shape, ref.shape)
    assert jnp.allclose(out, ref, rtol=1e-4, atol=1e-5), (out, ref)

    print("KERNEL_OK")
</pallas_src>

<mosaic_0001>
module attributes {stable_mosaic.version = 11 : i64} {
  func.func @kernel(%arg0: i32, %arg1: memref<2x32xf32, #tpu.memory_space<vmem>>, %arg2: memref<2x128x128xf32, #tpu.memory_space<vmem>>, %arg3: memref<2x128xf32, #tpu.memory_space<vmem>>, %arg4: memref<2x128xf32, #tpu.memory_space<vmem>>) attributes {dimension_semantics = [#tpu.dimension_semantics<arbitrary>], iteration_bounds = array<i64: 1>, scalar_prefetch = 0 : i64, scratch_operands = 0 : i64, tpu.core_type = #tpu.core_type<tc>, window_params = [{pipeline_mode = #tpu.pipeline_mode<synchronous>, transform_indices = @transform_0, window_bounds = array<i64: 2, 32>}, {pipeline_mode = #tpu.pipeline_mode<synchronous>, transform_indices = @transform_1, window_bounds = array<i64: 2, 128, 128>}, {pipeline_mode = #tpu.pipeline_mode<synchronous>, transform_indices = @transform_2, window_bounds = array<i64: 2, 128>}, {pipeline_mode = #tpu.pipeline_mode<synchronous>, transform_indices = @transform_3, window_bounds = array<i64: 2, 128>}]} {
    %c0 = arith.constant 0 : index
    %c0_0 = arith.constant 0 : index
    %0 = vector.load %arg1[%c0, %c0_0] : memref<2x32xf32, #tpu.memory_space<vmem>>, vector<2x32xf32>
    %c0_1 = arith.constant 0 : index
    %c0_2 = arith.constant 0 : index
    %c0_3 = arith.constant 0 : index
    %1 = vector.load %arg2[%c0_1, %c0_2, %c0_3] : memref<2x128x128xf32, #tpu.memory_space<vmem>>, vector<1x32x128xf32>
    %2 = vector.shape_cast %1 : vector<1x32x128xf32> to vector<32x128xf32>
    %cst = arith.constant dense<0.000000e+00> : vector<2x128xf32>
    %3 = tpu.matmul %0, %2, %cst {dimension_numbers = #tpu.dot_dimension_numbers<[1], [0], [0], [1], [0, 0, 1, 1], [], []>} : vector<2x32xf32>, vector<32x128xf32>, vector<2x128xf32> -> vector<2x128xf32>
    %c0_4 = arith.constant 0 : index
    %c0_5 = arith.constant 0 : index
    %4 = vector.load %arg3[%c0_4, %c0_5] : memref<2x128xf32, #tpu.memory_space<vmem>>, vector<1x128xf32>
    %5 = vector.broadcast %4 : vector<1x128xf32> to vector<2x128xf32>
    %6 = arith.addf %3, %5 : vector<2x128xf32>
    %cst_6 = arith.constant -1.000000e+00 : f32
    %cst_7 = arith.constant 1.000000e+00 : f32
    %7 = vector.broadcast %cst_6 : f32 to vector<2x128xf32>
    %8 = arith.maximumf %7, %6 : vector<2x128xf32>
    %9 = vector.broadcast %cst_7 : f32 to vector<2x128xf32>
    %10 = arith.minimumf %9, %8 : vector<2x128xf32>
    %c1 = arith.constant 1 : index
    %c0_8 = arith.constant 0 : index
    %c0_9 = arith.constant 0 : index
    %11 = vector.load %arg2[%c1, %c0_8, %c0_9] : memref<2x128x128xf32, #tpu.memory_space<vmem>>, vector<1x128x128xf32>
    %12 = vector.shape_cast %11 : vector<1x128x128xf32> to vector<128x128xf32>
    %cst_10 = arith.constant dense<0.000000e+00> : vector<2x128xf32>
    %13 = tpu.matmul %10, %12, %cst_10 {dimension_numbers = #tpu.dot_dimension_numbers<[1], [0], [0], [1], [0, 0, 1, 1], [], []>} : vector<2x128xf32>, vector<128x128xf32>, vector<2x128xf32> -> vector<2x128xf32>
    %c1_11 = arith.constant 1 : index
    %c0_12 = arith.constant 0 : index
    %14 = vector.load %arg3[%c1_11, %c0_12] : memref<2x128xf32, #tpu.memory_space<vmem>>, vector<1x128xf32>
    %15 = vector.broadcast %14 : vector<1x128xf32> to vector<2x128xf32>
    %16 = arith.addf %13, %15 : vector<2x128xf32>
    %cst_13 = arith.constant -1.000000e+00 : f32
    %cst_14 = arith.constant 1.000000e+00 : f32
    %17 = vector.broadcast %cst_13 : f32 to vector<2x128xf32>
    %18 = arith.maximumf %17, %16 : vector<2x128xf32>
    %19 = vector.broadcast %cst_14 : f32 to vector<2x128xf32>
    %20 = arith.minimumf %19, %18 : vector<2x128xf32>
    %c0_15 = arith.constant 0 : index
    %c0_16 = arith.constant 0 : index
    %21 = vector.load %arg4[%c0_15, %c0_16] : memref<2x128xf32, #tpu.memory_space<vmem>>, vector<2x128xf32>
    tpu.vector_store %arg4[%c0_15, %c0_16], %20 {strides = array<i32>} : memref<2x128xf32, #tpu.memory_space<vmem>>, vector<2x128xf32>,
    return
  }
  func.func @transform_0(%arg0: i32) -> (i32, i32) {
    %c0_i32 = arith.constant 0 : i32
    %c0_i32_0 = arith.constant 0 : i32
    %c0_i32_1 = arith.constant 0 : i32
    return %c0_i32, %c0_i32_0 : i32, i32
  }
  func.func @transform_1(%arg0: i32) -> (i32, i32, i32) {
    %c0_i32 = arith.constant 0 : i32
    %c0_i32_0 = arith.constant 0 : i32
    %c0_i32_1 = arith.constant 0 : i32
    %c0_i32_2 = arith.constant 0 : i32
    return %c0_i32, %c0_i32_0, %c0_i32_1 : i32, i32, i32
  }
  func.func @transform_2(%arg0: i32) -> (i32, i32) {
    %c0_i32 = arith.constant 0 : i32
    %c0_i32_0 = arith.constant 0 : i32
    %c0_i32_1 = arith.constant 0 : i32
    return %c0_i32, %c0_i32_0 : i32, i32
  }
  func.func @transform_3(%arg0: i32) -> (i32, i32) {
    %c0_i32 = arith.constant 0 : i32
    %c0_i32_0 = arith.constant 0 : i32
    %c0_i32_1 = arith.constant 0 : i32
    return %c0_i32, %c0_i32_0 : i32, i32
  }
}

</mosaic_0001>

<bundles_post_ra>
// kernel: conv2d_batchnorm_forward.1
= control target key start
LH: loop header
LB: loop body
LE: loop exit
PB: predicated region body
PF: predicated region fallthrough
CT: control target
= control target key end

     0   :  { %v324_v1 = vmov 0.0   ;;  %vm325_vm0 = vmmov 0   ;;  %vm25_vm1 = vcmask 261120   ;;  %s443_s0 = inlined_call_operand.vmem [shape: f32[2,32], index: 0, kind: input, shape index: {}]   ;;  %s444_s1 = inlined_call_operand.vmem [shape: f32[2,128,128], index: 1, kind: input, shape index: {}]   ;;  %s445_s2 = inlined_call_operand.vmem [shape: f32[2,128], index: 2, kind: input, shape index: {}]   ;;  %s446_s3 = inlined_call_operand.hbm [shape: f32[2,128], index: 3, kind: output, shape index: {}]  }
   0x1   :  { %v19_v0 = vld [vmem:[%s444_s1 + $0x18] sm:$0xff]  ;;  %253 = vmatprep.subr.mxu0 %v324_v1  ;;  %v18_v2 = vld [vmem:[%s444_s1 + $0x10] sm:$0xff]  ;;  %261 = vmatprep.mubr.msk.f32.mxu0 %vm325_vm0, %v324_v1  ;;  %v17_v5 = vld [vmem:[%s444_s1 + $0x8] sm:$0xff] }
   0x2   :  { %v228_v3 = vld [vmem:[%s444_s1 + $0xf8] sm:$0xff]  ;;  %254 = vmatpush3.msra.mxu0 %v19_v0  ;;  %264 = vmatprep.subr.mxu1 %v324_v1  ;;  %v227_v4 = vld [vmem:[%s444_s1 + $0xf0] sm:$0xff]  ;;  %v226_v6 = vld [vmem:[%s444_s1 + $0xe8] sm:$0xff] }
   0x3   :  { %255 = vmatprep.subr.mxu0 %v324_v1  ;;  %265 = vmatpush3.msra.mxu1 %v228_v3  ;;  %v16_v7 = vld [vmem:[%s444_s1] sm:$0xff] }
   0x4   :  { %256 = vmatpush3.msra.mxu0 %v18_v2  ;;  %266 = vmatprep.subr.mxu1 %v324_v1  ;;  %v15_v8 = vld [vmem:[%s443_s0] sm:$0x3] }
   0x5   :  { %257 = vmatprep.subr.mxu0 %v324_v1  ;;  %267 = vmatpush3.msra.mxu1 %v227_v4  ;;  %v225_v9 = vld [vmem:[%s444_s1 + $0xe0] sm:$0xff] }
   0x6   :  { %258 = vmatpush3.msra.mxu0 %v17_v5  ;;  %268 = vmatprep.subr.mxu1 %v324_v1 }
   0x7   :  { %8 = vsyncpa [#allocation3], 0  ;;  %259 = vmatprep.subr.mxu0 %v324_v1  ;;  %269 = vmatpush3.msra.mxu1 %v226_v6  ;;  %v224_v10 = vld [vmem:[%s444_s1 + $0xd8] sm:$0xff]  ;;  %v223_v11 = vld [vmem:[%s444_s1 + $0xd0] sm:$0xff]  ;;  %s326_s30 = smov [#allocation2]  }
   0x8   :  { %260 = vmatpush3.msra.mxu0 %v16_v7  ;;  %270 = vmatprep.subr.mxu1 %v324_v1  ;;  %v222_v12 = vld [vmem:[%s444_s1 + $0xc8] sm:$0xff]  ;;  %v221_v13 = vld [vmem:[%s444_s1 + $0xc0] sm:$0xff]  ;;  %v220_v14 = vld [vmem:[%s444_s1 + $0xb8] sm:$0xff]  ;;  %s202_s4 = sshll.u32 %s326_s30, 4  ;;  %s203_s4 = int_to_ptr.vmem [resolvable:$true] %s202_s4 }
   0x9   :  { %262 = vmatmul.mubr.msk.f32.vlgmr.msra.gmra.mxu0 %vm25_vm1, %v15_v8  ;;  %271 = vmatpush3.msra.mxu1 %v225_v9  ;;  %v219_v15 = vld [vmem:[%s444_s1 + $0xb0] sm:$0xff]  ;;  %v218_v16 = vld [vmem:[%s444_s1 + $0xa8] sm:$0xff]  ;;  %v217_v17 = vld [vmem:[%s444_s1 + $0xa0] sm:$0xff]  ;;  %p307_p1 = scmp.lt.s32.totalorder %s203_s4, %s203_s4 }
   0xa   :  { %272 = vmatprep.subr.mxu1 %v324_v1  ;;  %296 = vmatprep.mubr.msk.f32.mxu1 %vm325_vm0, %v324_v1  ;;  %v216_v18 = vld [vmem:[%s444_s1 + $0x98] sm:$0xff]  ;;  %v215_v19 = vld [vmem:[%s444_s1 + $0x90] sm:$0xff]  ;;  %v214_v20 = vld [vmem:[%s444_s1 + $0x88] sm:$0xff] }
   0xb   :  { %273 = vmatpush3.msra.mxu1 %v224_v10  ;;  %v213_v21 = vld [vmem:[%s444_s1 + $0x80] sm:$0xff]  ;;  %s302_s1 = scalar_lea.vmem %s203_s4, 32 }
   0xc   :  { %274 = vmatprep.subr.mxu1 %v324_v1  ;;  %v210_v22 = vld [vmem:[%s445_s2] ss:$0 sm:$0xff]  ;;  %v229_v27 = vld [vmem:[%s445_s2 + $0x1] ss:$0 sm:$0xff]  ;;  %p303_p0 = scmp.ne.s32.totalorder %s203_s4, %s302_s1  ;;  %p308_p2 = scmp.lt.s32.totalorder %s302_s1, %s302_s1 }
   0xd   :  { %275 = vmatpush3.msra.mxu1 %v223_v11 }
   0xe   :  { %276 = vmatprep.subr.mxu1 %v324_v1  ;;  %p309_p3 = por %p308_p2, %p307_p1 }
   0xf   :  { %277 = vmatpush3.msra.mxu1 %v222_v12 }
  0x10   :  { %278 = vmatprep.subr.mxu1 %v324_v1  ;;  %p310_p4 = pnand %p309_p3, %p303_p0 }
  0x11   :  { %279 = vmatpush3.msra.mxu1 %v221_v13 }
  0x12   :  { %280 = vmatprep.subr.mxu1 %v324_v1 }
  0x13   :  { %281 = vmatpush3.msra.mxu1 %v220_v14 }
  0x14   :  { %282 = vmatprep.subr.mxu1 %v324_v1 }
  0x15   :  { %283 = vmatpush3.msra.mxu1 %v219_v15 }
  0x16   :  { %284 = vmatprep.subr.mxu1 %v324_v1 }
  0x17   :  { %285 = vmatpush3.msra.mxu1 %v218_v16 }
  0x18   :  { %286 = vmatprep.subr.mxu1 %v324_v1 }
  0x19   :  { %287 = vmatpush3.msra.mxu1 %v217_v17 }
  0x1a   :  { %288 = vmatprep.subr.mxu1 %v324_v1 }
  0x1b   :  { %289 = vmatpush3.msra.mxu1 %v216_v18 }
  0x1c   :  { %290 = vmatprep.subr.mxu1 %v324_v1 }
  0x1d   :  { %291 = vmatpush3.msra.mxu1 %v215_v19 }
  0x1e   :  { %292 = vmatprep.subr.mxu1 %v324_v1 }
  0x1f   :  { %293 = vmatpush3.msra.mxu1 %v214_v20 }
  0x20   :  { %294 = vmatprep.subr.mxu1 %v324_v1 }
  0x21   :  { %295 = vmatpush3.msra.mxu1 %v213_v21 }
  0xc9   :  { %v95_v23 = vpop.f32.mrf.mxu0 }
  0xca   :  { %v96_v24 = vadd.f32 %v210_v22, %v95_v23 }
  0xcb   :  { %v263_v25 = vpop.f32.mrf.mxu0 }
  0xcc   :  { %v212_v26 = vclamps-f32 %v96_v24, 1.0 }
  0xce   :  { %297 = vmatmul.mubr.f32.vlgmr.msra.gmra.mxu1 %v212_v26 }
 0x18e   :  { %v189_v28 = vpop.f32.mrf.mxu1 }
 0x18f   :  { %v190_v29 = vadd.f32 %v229_v27, %v189_v28 }
 0x190   :  { %v298_v30 = vpop.f32.mrf.mxu1 }
 0x191   :  { %v230_v31 = vclamps-f32 %v190_v29, 1.0 }
 0x193   :  { %195 = vst [vmem:[#allocation2] sm:$0x3] %v230_v31 }
 0x194   :  { %313 = shalt.err (!%p310_p4)
}
 0x195   :  { %205 = dma.vmem_to_hbm [thread:$0]  %s203_s4, 32, %s446_s3, [#allocation3]  }
 0x196   :  { %322 = dma.done.wait [#allocation3], 32  }
 0x197   :  { %323 = vsyncadd [#allocation3], 4294967264 }
 0x198   :  { %209 = vsyncpa [#allocation3], 1 }

</bundles_post_ra>
